<compile_context>
chip_gen: v7x
topology: tpu7x:2x2x1
jax: 0.10.0
libtpu: 0.0.40
codegen_flags: <defaults>
</compile_context>

<pallas_src>
import jax
import jax.numpy as jnp
from jax.experimental import pallas as pl
from jax.experimental.pallas import tpu as pltpu


def _tanh_relu_triple_kernel(x_ref, o_ref):
    # x_ref: (B, F) in VMEM; o_ref: (B, 3F) in VMEM
    r = jnp.maximum(jnp.tanh(x_ref[...]), 0.0)          # relu(tanh(x)), (B, F)
    B, F = r.shape
    # Replicate along a new middle axis and flatten: identical to
    # cat([r, r, r], dim=-1). One full-width unmasked store.
    o_ref[...] = jnp.broadcast_to(r[:, None, :], (B, 3, F)).reshape(B, 3 * F)


def model_forward(x):
    """x: (B, C, L) float32 -> (B, 3*C*L) float32 (matches torch Model.forward)."""
    B = x.shape[0]
    F = 1
    for d in x.shape[1:]:
        F *= d
    x2d = x.reshape(B, F)  # glue: torch x.view(B, -1)

    out = pl.pallas_call(
        _tanh_relu_triple_kernel,
        out_shape=jax.ShapeDtypeStruct((B, 3 * F), x.dtype),
        in_specs=[pl.BlockSpec(memory_space=pltpu.MemorySpace.VMEM)],
        out_specs=pl.BlockSpec(memory_space=pltpu.MemorySpace.VMEM),
    )(x2d)
    return out


if __name__ == "__main__":
    key = jax.random.PRNGKey(0)
    x = jax.random.normal(key, (2, 3, 4), dtype=jnp.float32)

    out = model_forward(x)
    jax.block_until_ready(out)

    # pure-JAX reference mirroring the torch module exactly
    ref = x.reshape(2, -1)
    ref = jnp.tanh(ref)
    ref = ref[:, None, :]
    ref = jnp.concatenate([ref, ref, ref], axis=-1)
    ref = jnp.maximum(ref.reshape(2, -1), 0.0)

    assert out.shape == (2, 36), f"bad shape {out.shape}"
    assert jnp.allclose(out, ref, atol=1e-5, rtol=1e-5), "mismatch vs reference"

    print("KERNEL_OK")
</pallas_src>

<mosaic_0001>
module attributes {stable_mosaic.version = 11 : i64} {
  func.func @_tanh_relu_triple_kernel(%arg0: memref<2x12xf32, #tpu.memory_space<vmem>>, %arg1: memref<2x36xf32, #tpu.memory_space<vmem>>) attributes {dimension_semantics = [], scalar_prefetch = 0 : i64, scratch_operands = 0 : i64, tpu.core_type = #tpu.core_type<tc>} {
    %c0 = arith.constant 0 : index
    %c0_0 = arith.constant 0 : index
    %0 = vector.load %arg0[%c0, %c0_0] : memref<2x12xf32, #tpu.memory_space<vmem>>, vector<2x12xf32>
    %1 = math.tanh %0 : vector<2x12xf32>
    %cst = arith.constant 0.000000e+00 : f32
    %2 = vector.broadcast %cst : f32 to vector<2x12xf32>
    %3 = arith.maximumf %1, %2 : vector<2x12xf32>
    %4 = vector.shape_cast %3 : vector<2x12xf32> to vector<2x1x12xf32>
    %5 = vector.shape_cast %4 : vector<2x1x12xf32> to vector<2x1x12xf32>
    %6 = vector.broadcast %5 : vector<2x1x12xf32> to vector<2x3x12xf32>
    %7 = vector.shape_cast %6 : vector<2x3x12xf32> to vector<2x36xf32>
    %c0_1 = arith.constant 0 : index
    %c0_2 = arith.constant 0 : index
    %8 = vector.load %arg1[%c0_1, %c0_2] : memref<2x36xf32, #tpu.memory_space<vmem>>, vector<2x36xf32>
    tpu.vector_store %arg1[%c0_1, %c0_2], %7 {strides = array<i32>} : memref<2x36xf32, #tpu.memory_space<vmem>>, vector<2x36xf32>,
    return
  }
}

</mosaic_0001>

<bundles_post_ra>
// kernel: tpu_custom_call.1
= control target key start
LH: loop header
LB: loop body
LE: loop exit
PB: predicated region body
PF: predicated region fallthrough
CT: control target
= control target key end

     0   :  { %6 = vsyncpa [#allocation3], 0  ;;  %s217_s0 = inlined_call_operand.hbm [shape: f32[2,12], index: 0, kind: input, shape index: {}]   ;;  %s218_s1 = inlined_call_operand.hbm [shape: f32[2,36], index: 1, kind: output, shape index: {}]  }
   0x1   :  { %7 = vsyncpa [#allocation4], 0  ;;  %s175_s6 = smov [#allocation2]   ;;  %s127_s10 = scalar_lea.hbm %s217_s0, 32 }
   0x2   :  { %s14_s7 = sshll.u32 %s175_s6, 4  ;;  %p128_p0 = scmp.ne.s32.totalorder %s217_s0, %s127_s10  ;;  %s15_s7 = int_to_ptr.vmem [resolvable:$true] %s14_s7 }
   0x3   :  { %p131_p1 = scmp.lt.u32.totalorder %s127_s10, %s217_s0 }
   0x5   :  { %p133_p2 = pnand %p131_p1, %p128_p0 }
   0x7   :  { %136 = shalt.err (!%p133_p2)
}
   0x8   :  { %s137_s15 = scalar_lea.vmem %s15_s7, 32  ;;  %p142_p4 = scmp.lt.s32.totalorder %s15_s7, %s15_s7 }
   0x9   :  { %p138_p3 = scmp.ne.s32.totalorder %s15_s7, %s137_s15  ;;  %p143_p5 = scmp.lt.s32.totalorder %s137_s15, %s137_s15 }
   0xb   :  { %p144_p6 = por %p143_p5, %p142_p4 }
   0xd   :  { %p145_p7 = pnand %p144_p6, %p138_p3 }
   0xf   :  { %148 = shalt.err (!%p145_p7)
}
  0x10   :  { %17 = dma.hbm_to_vmem [thread:$0]  %s217_s0, 32, %s15_s7, [#allocation3]  }
  0x11   :  { %171 = dma.done.wait [#allocation3], 32  }
  0x12   :  { %172 = vsyncadd [#allocation3], 4294967264  ;;  %v21_v0 = vld [vmem:[#allocation2] sm:$0x3]  ;;  %v176_v1 = vmov 1966171168   ;;  %v28_v3 = vlaneseq }
  0x13   :  { %125 = vtanh.f32 %v21_v0  ;;  %v26_v2 = vunpack.c.l.s4 %v176_v1  ;;  %v177_v6 = vmov 1983009808   ;;  %v178_v14 = vmov 1934713408   ;;  %s180_s0 = smov 12   ;;  %s181_s18 = smov 24  }
  0x14   :  { %v29_v5 = vshrl.u32 %v28_v3, 7  ;;  %v57_v7 = vunpack.c.l.s4 %v177_v6  ;;  %v74_v15 = vunpack.c.l.s4 %v178_v14  ;;  %v179_v29 = vmov 0.0   ;;  %s182_s19 = smov [#allocation5]  }
  0x15   :  { %v27_v4 = vunpack.c.0.s8 %v26_v2  ;;  %vm96_vm0 = vcmask 97280   ;;  %s108_s20 = sshll.u32 %s182_s19, 4  ;;  %vm98_vm1 = vcmask 195584   ;;  %vm100_vm2 = vcmask 287744   ;;  %s109_s20 = int_to_ptr.vmem [resolvable:$true] %s108_s20 }
  0x16   :  { %v58_v11 = vunpack.c.0.s8 %v57_v7  ;;  %v49_v13 = vsub.s32 0, %v29_v5  ;;  %v75_v21 = vunpack.c.0.s8 %v74_v15  ;;  %s149_s21 = scalar_lea.vmem %s109_s20, 32  ;;  %p154_p9 = scmp.lt.s32.totalorder %s109_s20, %s109_s20 }
  0x17   :  { %v30_v8 = vsub.s32 %v27_v4, %v29_v5  ;;  %p150_p8 = scmp.ne.s32.totalorder %s109_s20, %s149_s21  ;;  %p155_p10 = scmp.lt.s32.totalorder %s149_s21, %s149_s21 }
  0x18   :  { %v61_v18 = vsub.s32 %v58_v11, %v29_v5  ;;  %v78_v25 = vsub.s32 %v75_v21, %v29_v5 }
  0x19   :  { %p156_p11 = por %p155_p10, %p154_p9 }
  0x1b   :  { %p157_p12 = pnand %p156_p11, %p150_p8 }
  0x1d   :  { %v126_v9 = vpop.eup %125 }
  0x1e   :  { %v23_v10 = vmax.f32 %v126_v9, 0.0 }
  0x20   :  { %v31_v12 = vrot.slane %v23_v10, %v30_v8 }
  0x22   :  { %v32_v16 = vcombine.high %v31_v12, %v31_v12  ;;  %v39_v17 = vrot.slane %v31_v12, %v30_v8 }
  0x24   :  { %v46_v19 = vrot.slane %v32_v16, %v30_v8  ;;  %v50_v20 = vrot.slane %v39_v17, %v49_v13 }
  0x26   :  { %v54_v22 = vrot.slane %v46_v19, %v49_v13  ;;  %v62_v23 = vrot.slane %v50_v20, %v61_v18 }
  0x28   :  { %v70_v24 = vrot.slane %v54_v22, %v61_v18 }
  0x2a   :  { %v71_v26 = vcombine.low %v62_v23, %v70_v24  ;;  %v72_v28 = vcombine.high %v62_v23, %v70_v24 }
  0x2c   :  { %v79_v27 = vrot.slane %v71_v26, %v78_v25  ;;  %v87_v31 = vrot.slane %v72_v28, %v78_v25 }
  0x2e   :  { %v80_v30 = vcombine.high %v79_v27, %v179_v29 }
  0x30   :  { %89 = vrot.lane.b32.xlu0 %v80_v30, %s180_s0 }
  0x34   :  { %93 = vrot.lane.b32.xlu0 %v87_v31, %s181_s18 }
  0xa2   :  { %v90_v32 = vpop.permute.xlu0 %89 }
  0xa3   :  { %v97_v33 = vsel %vm96_vm0, %v79_v27, %v90_v32 }
  0xa6   :  { %v94_v34 = vpop.permute.xlu0 %93 }
  0xa7   :  { %v99_v35 = vsel %vm98_vm1, %v97_v33, %v94_v34 }
  0xa8   :  { %101 = vst.msk [vmem:[#allocation5] sm:$0x3] %vm100_vm2, %v99_v35 }
  0xa9   :  { %160 = shalt.err (!%p157_p12)
}
  0xaa   :  { %s161_s24 = scalar_lea.hbm %s218_s1, 32 }
  0xab   :  { %p162_p13 = scmp.ne.s32.totalorder %s218_s1, %s161_s24  ;;  %p165_p0 = scmp.lt.u32.totalorder %s161_s24, %s218_s1 }
  0xad   :  { %p167_p1 = pnand %p165_p0, %p162_p13 }
  0xaf   :  { %170 = shalt.err (!%p167_p1)
}
  0xb0   :  { %111 = dma.vmem_to_hbm [thread:$0]  %s109_s20, 32, %s218_s1, [#allocation4]  }
  0xb1   :  { %173 = dma.done.wait [#allocation4], 32  }
  0xb2   :  { %174 = vsyncadd [#allocation4], 4294967264 }
  0xb3   :  { %115 = vsyncpa [#allocation3], 1 }
  0xb4   :  { %116 = vsyncpa [#allocation4], 1 }

</bundles_post_ra>
